<compile_context>
chip_gen: v7x
topology: tpu7x:2x2x1
jax: 0.10.0
libtpu: 0.0.40
codegen_flags: <defaults>
</compile_context>

<pallas_src>
import math

import jax
import jax.numpy as jnp
from jax.experimental import pallas as pl
from jax.experimental.pallas import tpu as pltpu


# ----------------------------- kernel -------------------------------------- #

def _add_pe_kernel(x_ref, pe_ref, o_ref):
    # x_ref, pe_ref, o_ref: (rows, D) blocks. Single fused, fully-aligned add.
    o_ref[...] = (x_ref[...] + pe_ref[...]).astype(o_ref.dtype)


# ----------------------------- wrappers ------------------------------------ #

def make_positional_encoding(d_model: int, seq_len: int) -> jnp.ndarray:
    """Precompute the (seq_len, d_model) sin/cos table, identical to the torch buffer."""
    position = jnp.arange(seq_len, dtype=jnp.float32)[:, None]                 # (S, 1)
    div_term = jnp.exp(jnp.arange(0, d_model, 2, dtype=jnp.float32)
                       * (-math.log(10000.0) / d_model))                       # (D/2,)
    angles = position * div_term                                               # (S, D/2)
    # interleave: even columns = sin, odd columns = cos (matches pe[:, 0::2] / pe[:, 1::2])
    pe = jnp.stack([jnp.sin(angles), jnp.cos(angles)], axis=-1)                # (S, D/2, 2)
    return pe.reshape(seq_len, d_model).astype(jnp.float32)


def positional_encoding(x: jnp.ndarray, pe: jnp.ndarray) -> jnp.ndarray:
    """x: (B, S, D) float32, pe: (seq_len, D) with seq_len >= S."""
    B, S, D = x.shape
    BS = B * S
    itemsize = jnp.dtype(x.dtype).itemsize

    # Flatten to (B*S, D): lane-dense (D = 768) and sublane-dense (BS = 24 = 3*8).
    x_flat = x.reshape(BS, D)
    # Broadcast pe[:S] across the batch in the wrapper so the kernel is a pure
    # aligned add (no in-kernel concat/reshape). pe[:, :x.shape[1], :] slice.
    pe_flat = jnp.broadcast_to(pe[:S][None], (B, S, D)).reshape(BS, D).astype(x.dtype)

    # Single block at small sizes; 512-row tiles (multiple of 8, ~85% of HBM
    # roofline per measured sweeps, VMEM-safe on v5e/v6e/v7x) if it ever scales.
    block_rows = BS if BS <= 1024 else 512
    grid = (pl.cdiv(BS, block_rows),)

    out_flat = pl.pallas_call(
        _add_pe_kernel,
        out_shape=jax.ShapeDtypeStruct((BS, D), x.dtype),
        grid=grid,
        in_specs=[
            pl.BlockSpec((block_rows, D), lambda r: (r, 0)),   # x rows
            pl.BlockSpec((block_rows, D), lambda r: (r, 0)),   # matching pe rows
        ],
        out_specs=pl.BlockSpec((block_rows, D), lambda r: (r, 0)),
        input_output_aliases={0: 0},                           # in-place-able add
        cost_estimate=pl.CostEstimate(
            flops=BS * D,
            transcendentals=0,
            bytes_accessed=3 * BS * D * itemsize,
        ),
        compiler_params=pltpu.CompilerParams(
            dimension_semantics=("parallel",),                 # row blocks independent
        ),
    )(x_flat, pe_flat)

    return out_flat.reshape(B, S, D)


# ----------------------------- pure-JAX reference -------------------------- #

def _pos_enc_ref(x, pe):
    return x + pe[None, :x.shape[1], :]


# ----------------------------- main ---------------------------------------- #

if __name__ == "__main__":
    D_MODEL = 768      # module default
    SEQ_LEN = 15       # module default (buffer length)
    B, S = 2, 12       # input sequence shorter than the buffer to exercise the slice

    key = jax.random.PRNGKey(0)
    x = jax.random.normal(key, (B, S, D_MODEL), dtype=jnp.float32)

    pe = make_positional_encoding(D_MODEL, SEQ_LEN)    # register_buffer('pe', ...)

    out = positional_encoding(x, pe)
    out = jax.block_until_ready(out)

    ref = _pos_enc_ref(x, pe)
    assert out.shape == (B, S, D_MODEL)
    assert jnp.allclose(out, ref, rtol=1e-6, atol=1e-6), (
        f"max abs err = {jnp.max(jnp.abs(out - ref))}")

    print("KERNEL_OK")
</pallas_src>

<mosaic_0001>
module attributes {stable_mosaic.version = 11 : i64} {
  func.func @_add_pe_kernel(%arg0: i32, %arg1: memref<24x768xf32, #tpu.memory_space<vmem>>, %arg2: memref<24x768xf32, #tpu.memory_space<vmem>>, %arg3: memref<24x768xf32, #tpu.memory_space<vmem>>) attributes {dimension_semantics = [#tpu.dimension_semantics<parallel>], iteration_bounds = array<i64: 1>, scalar_prefetch = 0 : i64, scratch_operands = 0 : i64, tpu.core_type = #tpu.core_type<tc>, window_params = [{transform_indices = @transform_0, window_bounds = array<i64: 24, 768>}, {transform_indices = @transform_1, window_bounds = array<i64: 24, 768>}, {transform_indices = @transform_2, window_bounds = array<i64: 24, 768>}]} {
    %c0 = arith.constant 0 : index
    %c0_0 = arith.constant 0 : index
    %0 = vector.load %arg1[%c0, %c0_0] : memref<24x768xf32, #tpu.memory_space<vmem>>, vector<24x768xf32>
    %c0_1 = arith.constant 0 : index
    %c0_2 = arith.constant 0 : index
    %1 = vector.load %arg2[%c0_1, %c0_2] : memref<24x768xf32, #tpu.memory_space<vmem>>, vector<24x768xf32>
    %2 = arith.addf %0, %1 : vector<24x768xf32>
    %c0_3 = arith.constant 0 : index
    %c0_4 = arith.constant 0 : index
    %3 = vector.load %arg3[%c0_3, %c0_4] : memref<24x768xf32, #tpu.memory_space<vmem>>, vector<24x768xf32>
    tpu.vector_store %arg3[%c0_3, %c0_4], %2 {strides = array<i32>} : memref<24x768xf32, #tpu.memory_space<vmem>>, vector<24x768xf32>,
    return
  }
  func.func @transform_0(%arg0: i32) -> (i32, i32) {
    %c0_i32 = arith.constant 0 : i32
    %c0_i32_0 = arith.constant 0 : i32
    return %arg0, %c0_i32 : i32, i32
  }
  func.func @transform_1(%arg0: i32) -> (i32, i32) {
    %c0_i32 = arith.constant 0 : i32
    %c0_i32_0 = arith.constant 0 : i32
    return %arg0, %c0_i32 : i32, i32
  }
  func.func @transform_2(%arg0: i32) -> (i32, i32) {
    %c0_i32 = arith.constant 0 : i32
    %c0_i32_0 = arith.constant 0 : i32
    return %arg0, %c0_i32 : i32, i32
  }
}

</mosaic_0001>

<bundles_post_ra>
// kernel: tpu_custom_call.1
= control target key start
LH: loop header
LB: loop body
LE: loop exit
PB: predicated region body
PF: predicated region fallthrough
CT: control target
= control target key end

     0   :  { %7 = vsyncpa [#allocation3], 0  ;;  %s270_s0 = inlined_call_operand.hbm [shape: f32[24,768], index: 0, kind: input, shape index: {}, may-alias: {0,2}]   ;;  %s271_s1 = inlined_call_operand.vmem [shape: f32[24,768], index: 1, kind: input, shape index: {}]   ;;  %s272_s2 = inlined_call_operand.hbm [shape: f32[24,768], index: 2, kind: output, shape index: {}, may-alias: {0,2}]  }
   0x1   :  { %8 = vsyncpa [#allocation4], 0  ;;  %s167_s9 = smov [#allocation2]   ;;  %s119_s13 = scalar_lea.hbm %s270_s0, 2304 }
   0x2   :  { %s14_s10 = sshll.u32 %s167_s9, 4  ;;  %p120_p0 = scmp.ne.s32.totalorder %s270_s0, %s119_s13  ;;  %s15_s10 = int_to_ptr.vmem [resolvable:$true] %s14_s10 }
   0x3   :  { %p123_p1 = scmp.lt.u32.totalorder %s119_s13, %s270_s0 }
   0x5   :  { %p125_p2 = pnand %p123_p1, %p120_p0 }
   0x7   :  { %128 = shalt.err (!%p125_p2)
}
   0x8   :  { %s129_s18 = scalar_lea.vmem %s15_s10, 2304  ;;  %p134_p4 = scmp.lt.s32.totalorder %s15_s10, %s15_s10 }
   0x9   :  { %p130_p3 = scmp.ne.s32.totalorder %s15_s10, %s129_s18  ;;  %p135_p5 = scmp.lt.s32.totalorder %s129_s18, %s129_s18 }
   0xb   :  { %p136_p6 = por %p135_p5, %p134_p4 }
   0xd   :  { %p137_p7 = pnand %p136_p6, %p130_p3 }
   0xf   :  { %140 = shalt.err (!%p137_p7)
}
  0x10   :  { %s168_s19 = smov 768   ;;  %s169_s20 = smov 48  }
  0x11   :  { %20 = dma.hbm_to_vmem [thread:$0]  %s270_s0, 2304, %s15_s10, [#allocation3], %s168_s19, %s168_s19, %s169_s20  }
  0x12   :  { %163 = dma.done.wait [#allocation3], 2304  }
  0x13   :  { %164 = vsyncadd [#allocation3], 4294964992  ;;  %v26_v0 = vld [vmem:[#allocation2] sm:$0xff]  ;;  %v27_v2 = vld [vmem:[#allocation2 + $0x8] sm:$0xff]  ;;  %s170_s26 = smov [#allocation5]  }
  0x14   :  { %v44_v1 = vld [vmem:[%s271_s1] sm:$0xff]  ;;  %v45_v4 = vld [vmem:[%s271_s1 + $0x8] sm:$0xff]  ;;  %v28_v5 = vld [vmem:[#allocation2 + $0x10] sm:$0xff]  ;;  %s103_s27 = sshll.u32 %s170_s26, 4  ;;  %s104_s27 = int_to_ptr.vmem [resolvable:$true] %s103_s27 }
  0x15   :  { %v62_v3 = vadd.f32 %v44_v1, %v26_v0  ;;  %v46_v6 = vld [vmem:[%s271_s1 + $0x10] sm:$0xff]  ;;  %v63_v7 = vadd.f32 %v45_v4, %v27_v2  ;;  %v29_v9 = vld [vmem:[#allocation2 + $0x18] sm:$0xff]  ;;  %v30_v11 = vld [vmem:[#allocation2 + $0x20] sm:$0xff]  ;;  %s141_s5 = scalar_lea.vmem %s104_s27, 2304  ;;  %p146_p9 = scmp.lt.s32.totalorder %s104_s27, %s104_s27 }
  0x16   :  { %v64_v8 = vadd.f32 %v46_v6, %v28_v5  ;;  %v47_v10 = vld [vmem:[%s271_s1 + $0x18] sm:$0xff]  ;;  %v48_v13 = vld [vmem:[%s271_s1 + $0x20] sm:$0xff]  ;;  %v31_v14 = vld [vmem:[#allocation2 + $0x28] sm:$0xff]  ;;  %p142_p8 = scmp.ne.s32.totalorder %s104_s27, %s141_s5  ;;  %p147_p10 = scmp.lt.s32.totalorder %s141_s5, %s141_s5 }
  0x17   :  { %80 = vst [vmem:[#allocation5] sm:$0xff] %v62_v3  ;;  %v65_v12 = vadd.f32 %v47_v10, %v29_v9  ;;  %v49_v15 = vld [vmem:[%s271_s1 + $0x28] sm:$0xff]  ;;  %81 = vst [vmem:[#allocation5 + $0x8] sm:$0xff] %v63_v7  ;;  %v66_v16 = vadd.f32 %v48_v13, %v30_v11  ;;  %v32_v18 = vld [vmem:[#allocation2 + $0x30] sm:$0xff] }
  0x18   :  { %82 = vst [vmem:[#allocation5 + $0x10] sm:$0xff] %v64_v8  ;;  %v67_v17 = vadd.f32 %v49_v15, %v31_v14  ;;  %v50_v19 = vld [vmem:[%s271_s1 + $0x30] sm:$0xff]  ;;  %v33_v20 = vld [vmem:[#allocation2 + $0x38] sm:$0xff]  ;;  %v34_v23 = vld [vmem:[#allocation2 + $0x40] sm:$0xff]  ;;  %p148_p11 = por %p147_p10, %p146_p9 }
  0x19   :  { %83 = vst [vmem:[#allocation5 + $0x18] sm:$0xff] %v65_v12  ;;  %v68_v21 = vadd.f32 %v50_v19, %v32_v18  ;;  %v51_v22 = vld [vmem:[%s271_s1 + $0x38] sm:$0xff]  ;;  %v52_v24 = vld [vmem:[%s271_s1 + $0x40] sm:$0xff]  ;;  %84 = vst [vmem:[#allocation5 + $0x20] sm:$0xff] %v66_v16 }
  0x1a   :  { %85 = vst [vmem:[#allocation5 + $0x28] sm:$0xff] %v67_v17  ;;  %v69_v25 = vadd.f32 %v51_v22, %v33_v20  ;;  %v70_v26 = vadd.f32 %v52_v24, %v34_v23  ;;  %v35_v27 = vld [vmem:[#allocation2 + $0x48] sm:$0xff]  ;;  %v36_v29 = vld [vmem:[#allocation2 + $0x50] sm:$0xff]  ;;  %v37_v32 = vld [vmem:[#allocation2 + $0x58] sm:$0xff]  ;;  %p149_p12 = pnand %p148_p11, %p142_p8 }
  0x1b   :  { %v53_v28 = vld [vmem:[%s271_s1 + $0x48] sm:$0xff]  ;;  %86 = vst [vmem:[#allocation5 + $0x30] sm:$0xff] %v68_v21  ;;  %v54_v31 = vld [vmem:[%s271_s1 + $0x50] sm:$0xff]  ;;  %v55_v33 = vld [vmem:[%s271_s1 + $0x58] sm:$0xff] }
  0x1c   :  { %v71_v30 = vadd.f32 %v53_v28, %v35_v27  ;;  %87 = vst [vmem:[#allocation5 + $0x38] sm:$0xff] %v69_v25  ;;  %88 = vst [vmem:[#allocation5 + $0x40] sm:$0xff] %v70_v26  ;;  %v72_v34 = vadd.f32 %v54_v31, %v36_v29  ;;  %v73_v35 = vadd.f32 %v55_v33, %v37_v32  ;;  %v38_v36 = vld [vmem:[#allocation2 + $0x60] sm:$0xff]  ;;  %v39_v38 = vld [vmem:[#allocation2 + $0x68] sm:$0xff] }
  0x1d   :  { %v56_v37 = vld [vmem:[%s271_s1 + $0x60] sm:$0xff]  ;;  %v57_v40 = vld [vmem:[%s271_s1 + $0x68] sm:$0xff]  ;;  %v40_v41 = vld [vmem:[#allocation2 + $0x70] sm:$0xff] }
  0x1e   :  { %89 = vst [vmem:[#allocation5 + $0x48] sm:$0xff] %v71_v30  ;;  %v74_v39 = vadd.f32 %v56_v37, %v38_v36  ;;  %v58_v42 = vld [vmem:[%s271_s1 + $0x70] sm:$0xff]  ;;  %90 = vst [vmem:[#allocation5 + $0x50] sm:$0xff] %v72_v34  ;;  %v75_v43 = vadd.f32 %v57_v40, %v39_v38  ;;  %v41_v45 = vld [vmem:[#allocation2 + $0x78] sm:$0xff] }
  0x1f   :  { %91 = vst [vmem:[#allocation5 + $0x58] sm:$0xff] %v73_v35  ;;  %v76_v44 = vadd.f32 %v58_v42, %v40_v41  ;;  %v59_v46 = vld [vmem:[%s271_s1 + $0x78] sm:$0xff]  ;;  %v42_v47 = vld [vmem:[#allocation2 + $0x80] sm:$0xff]  ;;  %v43_v50 = vld [vmem:[#allocation2 + $0x88] sm:$0xff] }
  0x20   :  { %92 = vst [vmem:[#allocation5 + $0x60] sm:$0xff] %v74_v39  ;;  %v77_v48 = vadd.f32 %v59_v46, %v41_v45  ;;  %v60_v49 = vld [vmem:[%s271_s1 + $0x80] sm:$0xff]  ;;  %v61_v51 = vld [vmem:[%s271_s1 + $0x88] sm:$0xff]  ;;  %93 = vst [vmem:[#allocation5 + $0x68] sm:$0xff] %v75_v43 }
  0x21   :  { %94 = vst [vmem:[#allocation5 + $0x70] sm:$0xff] %v76_v44  ;;  %v78_v52 = vadd.f32 %v60_v49, %v42_v47  ;;  %v79_v53 = vadd.f32 %v61_v51, %v43_v50 }
  0x22   :  { %95 = vst [vmem:[#allocation5 + $0x78] sm:$0xff] %v77_v48 }
  0x23   :  { %96 = vst [vmem:[#allocation5 + $0x80] sm:$0xff] %v78_v52  ;;  %97 = vst [vmem:[#allocation5 + $0x88] sm:$0xff] %v79_v53 }
  0x24   :  { %152 = shalt.err (!%p149_p12)
}
  0x25   :  { %s153_s8 = scalar_lea.hbm %s272_s2, 2304 }
  0x26   :  { %p154_p13 = scmp.ne.s32.totalorder %s272_s2, %s153_s8  ;;  %p157_p0 = scmp.lt.u32.totalorder %s153_s8, %s272_s2 }
  0x28   :  { %p159_p1 = pnand %p157_p0, %p154_p13 }
  0x2a   :  { %162 = shalt.err (!%p159_p1)
}
  0x2b   :  { %109 = dma.vmem_to_hbm [thread:$0]  %s104_s27, 2304, %s272_s2, [#allocation4], %s168_s19, %s168_s19, %s169_s20  }
  0x2c   :  { %165 = dma.done.wait [#allocation4], 2304  }
  0x2d   :  { %166 = vsyncadd [#allocation4], 4294964992 }
  0x2e   :  { %113 = vsyncpa [#allocation3], 1 }
  0x2f   :  { %114 = vsyncpa [#allocation4], 1 }

</bundles_post_ra>
